<compile_context>
chip_gen: v7x
topology: tpu7x:2x2x1
jax: 0.10.0
libtpu: 0.0.40
codegen_flags: <defaults>
</compile_context>

<pallas_src>
import functools
import numpy as np
import jax
import jax.numpy as jnp
from jax.experimental import pallas as pl
from jax.experimental.pallas import tpu as pltpu


# ---------------- radix > 1 : grouped softmax over the radix axis ----------------
def _rsoftmax_kernel(x_ref, o_ref, *, radix):
    # x_ref block: (1, cardinality, radix, K)    o_ref block: (1, radix, cardinality, K)
    x = x_ref[...]                                    # (1, G, R, K)
    xs = [x[0, :, r, :] for r in range(radix)]        # R static slices, each (G, K)

    m = xs[0]
    for r in range(1, radix):
        m = jnp.maximum(m, xs[r])                     # VPU max, numerically stable softmax
    es = [jnp.exp(v - m) for v in xs]                 # EUP exp
    s = es[0]
    for r in range(1, radix):
        s = s + es[r]
    inv = 1.0 / s                                     # one reciprocal per (G, K) group

    for r in range(radix):
        # fold the PyTorch transpose(1, 2) into the store pattern:
        # output[b, r, g, k] = softmax_r( input[b, g, r, k] )
        o_ref[0, r, :, :] = es[r] * inv


# ---------------- radix == 1 : elementwise sigmoid ----------------
def _sigmoid_kernel(x_ref, o_ref):
    x = x_ref[...]
    o_ref[...] = 1.0 / (1.0 + jnp.exp(-x))


# ---------------- wrapper (matches rSoftMax.forward) ----------------
def rsoftmax_forward(x, *, radix, cardinality):
    x = x.astype(jnp.float32)
    B = x.shape[0]
    L = int(np.prod(x.shape[1:]))

    if radix > 1:
        G, R = cardinality, radix
        assert L % (G * R) == 0, "feature size must be divisible by radix * cardinality"
        K = L // (G * R)
        x4 = x.reshape(B, G, R, K)                    # contiguous view, free
        out = pl.pallas_call(
            functools.partial(_rsoftmax_kernel, radix=R),
            out_shape=jax.ShapeDtypeStruct((B, R, G, K), jnp.float32),
            grid=(B,),
            in_specs=[pl.BlockSpec((1, G, R, K), lambda b: (b, 0, 0, 0))],
            out_specs=pl.BlockSpec((1, R, G, K), lambda b: (b, 0, 0, 0)),
            compiler_params=pltpu.CompilerParams(
                dimension_semantics=("parallel",)),
        )(x4)
        return out.reshape(B, L)                      # contiguous view -> (B, -1), free
    else:
        x2 = x.reshape(B, L)
        out = pl.pallas_call(
            _sigmoid_kernel,
            out_shape=jax.ShapeDtypeStruct((B, L), jnp.float32),
        )(x2)
        return out.reshape(x.shape)


# ---------------- pure-JAX reference (same semantics as the PyTorch module) ----------------
def rsoftmax_reference(x, *, radix, cardinality):
    b = x.shape[0]
    if radix > 1:
        y = x.reshape(b, cardinality, radix, -1)
        y = jnp.transpose(y, (0, 2, 1, 3))            # (B, radix, cardinality, K)
        y = jax.nn.softmax(y, axis=1)
        return y.reshape(b, -1)
    return jax.nn.sigmoid(x)


if __name__ == "__main__":
    key = jax.random.PRNGKey(0)
    k1, k2, k3 = jax.random.split(key, 3)

    cases = [
        # (x_shape,        radix, cardinality)
        ((4, 4, 4, 4),      4,     4),   # shape used by the generated DBNet test
        ((2, 256, 1, 1),    2,     1),   # typical SplAtConv2d attention vector (K=128, lane dense)
        ((2, 8, 4, 4),      1,     2),   # radix == 1 -> sigmoid path
    ]

    for (shape, radix, card), kk in zip(cases, (k1, k2, k3)):
        x = jax.random.normal(kk, shape, jnp.float32)
        out = jax.block_until_ready(rsoftmax_forward(x, radix=radix, cardinality=card))
        ref = rsoftmax_reference(x, radix=radix, cardinality=card)
        if out.shape != ref.shape:
            raise AssertionError(f"shape mismatch {out.shape} vs {ref.shape} for {shape}")
        if not np.allclose(np.asarray(out), np.asarray(ref), rtol=1e-5, atol=1e-5):
            raise AssertionError(
                f"Pallas result mismatches JAX reference (shape={shape}, radix={radix})")

    print("KERNEL_OK")
</pallas_src>

<mosaic_0001>
module attributes {stable_mosaic.version = 11 : i64} {
  func.func @_rsoftmax_kernel(%arg0: i32, %arg1: memref<1x4x4x4xf32, #tpu.memory_space<vmem>>, %arg2: memref<1x4x4x4xf32, #tpu.memory_space<vmem>>) attributes {dimension_semantics = [#tpu.dimension_semantics<parallel>], iteration_bounds = array<i64: 4>, scalar_prefetch = 0 : i64, scratch_operands = 0 : i64, tpu.core_type = #tpu.core_type<tc>, window_params = [{transform_indices = @transform_0, window_bounds = array<i64: 1, 4, 4, 4>}, {transform_indices = @transform_1, window_bounds = array<i64: 1, 4, 4, 4>}]} {
    %c0 = arith.constant 0 : index
    %c0_0 = arith.constant 0 : index
    %c0_1 = arith.constant 0 : index
    %c0_2 = arith.constant 0 : index
    %0 = vector.load %arg1[%c0, %c0_0, %c0_1, %c0_2] : memref<1x4x4x4xf32, #tpu.memory_space<vmem>>, vector<1x4x4x4xf32>
    %1 = vector.extract_strided_slice %0 {offsets = [0, 0, 0, 0], sizes = [1, 4, 1, 4], strides = [1, 1, 1, 1]} : vector<1x4x4x4xf32> to vector<1x4x1x4xf32>
    %2 = vector.shape_cast %1 : vector<1x4x1x4xf32> to vector<4x4xf32>
    %3 = vector.extract_strided_slice %0 {offsets = [0, 0, 1, 0], sizes = [1, 4, 1, 4], strides = [1, 1, 1, 1]} : vector<1x4x4x4xf32> to vector<1x4x1x4xf32>
    %4 = vector.shape_cast %3 : vector<1x4x1x4xf32> to vector<4x4xf32>
    %5 = vector.extract_strided_slice %0 {offsets = [0, 0, 2, 0], sizes = [1, 4, 1, 4], strides = [1, 1, 1, 1]} : vector<1x4x4x4xf32> to vector<1x4x1x4xf32>
    %6 = vector.shape_cast %5 : vector<1x4x1x4xf32> to vector<4x4xf32>
    %7 = vector.extract_strided_slice %0 {offsets = [0, 0, 3, 0], sizes = [1, 4, 1, 4], strides = [1, 1, 1, 1]} : vector<1x4x4x4xf32> to vector<1x4x1x4xf32>
    %8 = vector.shape_cast %7 : vector<1x4x1x4xf32> to vector<4x4xf32>
    %9 = arith.maximumf %2, %4 : vector<4x4xf32>
    %10 = arith.maximumf %9, %6 : vector<4x4xf32>
    %11 = arith.maximumf %10, %8 : vector<4x4xf32>
    %12 = arith.subf %2, %11 : vector<4x4xf32>
    %13 = math.exp %12 : vector<4x4xf32>
    %14 = arith.subf %4, %11 : vector<4x4xf32>
    %15 = math.exp %14 : vector<4x4xf32>
    %16 = arith.subf %6, %11 : vector<4x4xf32>
    %17 = math.exp %16 : vector<4x4xf32>
    %18 = arith.subf %8, %11 : vector<4x4xf32>
    %19 = math.exp %18 : vector<4x4xf32>
    %20 = arith.addf %13, %15 : vector<4x4xf32>
    %21 = arith.addf %20, %17 : vector<4x4xf32>
    %22 = arith.addf %21, %19 : vector<4x4xf32>
    %cst = arith.constant 1.000000e+00 : f32
    %23 = vector.broadcast %cst : f32 to vector<4x4xf32>
    %24 = arith.divf %23, %22 : vector<4x4xf32>
    %25 = arith.mulf %13, %24 : vector<4x4xf32>
    %c0_3 = arith.constant 0 : index
    %c0_4 = arith.constant 0 : index
    %c0_5 = arith.constant 0 : index
    %c0_6 = arith.constant 0 : index
    %26 = vector.load %arg2[%c0_3, %c0_4, %c0_5, %c0_6] : memref<1x4x4x4xf32, #tpu.memory_space<vmem>>, vector<1x1x4x4xf32>
    %27 = vector.shape_cast %26 : vector<1x1x4x4xf32> to vector<4x4xf32>
    %28 = vector.shape_cast %25 : vector<4x4xf32> to vector<1x1x4x4xf32>
    tpu.vector_store %arg2[%c0_3, %c0_4, %c0_5, %c0_6], %28 {strides = array<i32>} : memref<1x4x4x4xf32, #tpu.memory_space<vmem>>, vector<1x1x4x4xf32>,
    %29 = arith.mulf %15, %24 : vector<4x4xf32>
    %c0_7 = arith.constant 0 : index
    %c1 = arith.constant 1 : index
    %c0_8 = arith.constant 0 : index
    %c0_9 = arith.constant 0 : index
    %30 = vector.load %arg2[%c0_7, %c1, %c0_8, %c0_9] : memref<1x4x4x4xf32, #tpu.memory_space<vmem>>, vector<1x1x4x4xf32>
    %31 = vector.shape_cast %30 : vector<1x1x4x4xf32> to vector<4x4xf32>
    %32 = vector.shape_cast %29 : vector<4x4xf32> to vector<1x1x4x4xf32>
    tpu.vector_store %arg2[%c0_7, %c1, %c0_8, %c0_9], %32 {strides = array<i32>} : memref<1x4x4x4xf32, #tpu.memory_space<vmem>>, vector<1x1x4x4xf32>,
    %33 = arith.mulf %17, %24 : vector<4x4xf32>
    %c0_10 = arith.constant 0 : index
    %c2 = arith.constant 2 : index
    %c0_11 = arith.constant 0 : index
    %c0_12 = arith.constant 0 : index
    %34 = vector.load %arg2[%c0_10, %c2, %c0_11, %c0_12] : memref<1x4x4x4xf32, #tpu.memory_space<vmem>>, vector<1x1x4x4xf32>
    %35 = vector.shape_cast %34 : vector<1x1x4x4xf32> to vector<4x4xf32>
    %36 = vector.shape_cast %33 : vector<4x4xf32> to vector<1x1x4x4xf32>
    tpu.vector_store %arg2[%c0_10, %c2, %c0_11, %c0_12], %36 {strides = array<i32>} : memref<1x4x4x4xf32, #tpu.memory_space<vmem>>, vector<1x1x4x4xf32>,
    %37 = arith.mulf %19, %24 : vector<4x4xf32>
    %c0_13 = arith.constant 0 : index
    %c3 = arith.constant 3 : index
    %c0_14 = arith.constant 0 : index
    %c0_15 = arith.constant 0 : index
    %38 = vector.load %arg2[%c0_13, %c3, %c0_14, %c0_15] : memref<1x4x4x4xf32, #tpu.memory_space<vmem>>, vector<1x1x4x4xf32>
    %39 = vector.shape_cast %38 : vector<1x1x4x4xf32> to vector<4x4xf32>
    %40 = vector.shape_cast %37 : vector<4x4xf32> to vector<1x1x4x4xf32>
    tpu.vector_store %arg2[%c0_13, %c3, %c0_14, %c0_15], %40 {strides = array<i32>} : memref<1x4x4x4xf32, #tpu.memory_space<vmem>>, vector<1x1x4x4xf32>,
    return
  }
  func.func @transform_0(%arg0: i32) -> (i32, i32, i32, i32) {
    %c0_i32 = arith.constant 0 : i32
    %c0_i32_0 = arith.constant 0 : i32
    %c0_i32_1 = arith.constant 0 : i32
    %c0_i32_2 = arith.constant 0 : i32
    return %arg0, %c0_i32, %c0_i32_0, %c0_i32_1 : i32, i32, i32, i32
  }
  func.func @transform_1(%arg0: i32) -> (i32, i32, i32, i32) {
    %c0_i32 = arith.constant 0 : i32
    %c0_i32_0 = arith.constant 0 : i32
    %c0_i32_1 = arith.constant 0 : i32
    %c0_i32_2 = arith.constant 0 : i32
    return %arg0, %c0_i32, %c0_i32_0, %c0_i32_1 : i32, i32, i32, i32
  }
}

</mosaic_0001>

<bundles_post_ra>
// kernel: tpu_custom_call.1
= control target key start
LH: loop header
LB: loop body
LE: loop exit
PB: predicated region body
PF: predicated region fallthrough
CT: control target
= control target key end

     0   :  { %6 = vsyncpa [#allocation3], 0  ;;  %s1002_s0 = inlined_call_operand.hbm [shape: f32[4,4,4,4], index: 0, kind: input, shape index: {}]   ;;  %s1003_s1 = inlined_call_operand.hbm [shape: f32[4,4,4,4], index: 1, kind: output, shape index: {}]  }
   0x1   :  { %8 = vsyncpa [#allocation3 + $0x1], 0 }
   0x2   :  { %9 = vsyncpa [#allocation4], 0 }
   0x3   :  { %11 = vsyncpa [#allocation4 + $0x1], 0  ;;  %s726_s6 = smov 0   ;;  %s728_s7 = smov 0  }
   0x4   :  { %s730_s8 = smov 0   ;;  %s732_s9 = smov 0  }
   0x5 LB: > { %s747_s10 = sadd.s32 4294967295, %s708_s9   ;;  %s503_s11 = sadd.s32 4294967294, %s708_s9   ;;  %s708_s9 = sphi %s732_s9, %s1015_s9   ;;  %s704_s8 = sphi %s730_s8, %s1014_s8   ;;  %s700_s7 = sphi %s728_s7, %s1013_s7   ;;  %s696_s6 = sphi %s726_s6, %s1012_s6  }
   0x6   : > { %s751_s12 = sadd.s32 1, %s708_s9   ;;  %s24_s13 = sadd.s32 1, %s704_s8 }
   0x7   : > { %s21_s14 = ssub.s32 %s708_s9, %s751_s12  ;;  %p31_p0 = scmp.ne.s32.totalorder %s704_s8, %s700_s7 }
   0x8   : > { %p22_p1 = scmp.eq.s32.totalorder %s21_s14, 0  ;;  %p32_p2 = scmp.eq.s32.totalorder %s708_s9, 0 }
   0x9   : > { %p37_p3 = scmp.ne.s32.totalorder %s700_s7, %s696_s6  ;;  %p38_p4 = scmp.eq.s32.totalorder %s747_s10, 0 }
   0xa   : > { %s763_s15 = scalar_select %p22_p1, %s704_s8, %s24_s13  }
   0xb   : > { %p765_p5 = por %p32_p2, %p31_p0  ;;  %p769_p6 = por %p38_p4, %p37_p3 }
   0xc   : > { %p61_p7 = scmp.eq.s32.totalorder %s747_s10, 3  ;;  %p67_p8 = scmp.eq.s32.totalorder %s503_s11, 3 }
   0xd   : > { %p534_p9 = scmp.lt.s32.totalorder %s708_s9, 4  ;;  %s87_s20 = sand.u32 1, %s704_s8  }
   0xe   : > { %p775_p10 = por %p61_p7, %p31_p0  ;;  %p779_p11 = por %p67_p8, %p37_p3 }
   0xf   : > { %s520_s21 = sshll.u32 %s708_s9, 8  ;;  %s506_s22 = sshll.u32 %s87_s20, 4 }
  0x10   : > { %s1007_s18 = scalar_select %p775_p10, 1, 0 }
  0x11   : > { %s1008_s19 = scalar_select %p779_p11, 1, 0 }
  0x12   : > { %s788_s25 = scalar_lea.hbm %s1002_s0, %s520_s21  ;;  %s91_s26 = scalar_lea.vmem [#allocation2], %s506_s22 }
  0x13   : > { %s98_s27 = sshll.u32 %s91_s26, 4  ;;  %p792_p12 = pnand %p534_p9, %p765_p5  ;;  %s796_s27 = int_to_ptr.vmem [resolvable:$true] %s98_s27 }
  0x14   : > { %s798_s29 = scalar_lea.sflag [#allocation3], %s87_s20  ;;  %s612_s30 = scalar_lea.hbm %s788_s25, 256 }
  0x15   : > { %p613_p13 = scmp.ne.s32.totalorder %s788_s25, %s612_s30  ;;  %p614_p0 = pneg %p792_p12 }
  0x16   : > { %s617_s4 = scalar_lea.hbm %s1002_s0, 1024  ;;  %p618_p3 = scmp.lt.u32.totalorder %s788_s25, %s1002_s0 }
  0x17   : > { %p615_p1 = pnand %p614_p0, %p613_p13  ;;  %p619_p4 = scmp.lt.u32.totalorder %s617_s4, %s612_s30 }
  0x18   : > { %p621_p7 = scmp.lt.u32.totalorder %s612_s30, %s788_s25 }
  0x19   : > { %p616_p2 = pneg %p615_p1  ;;  %p620_p5 = por %p619_p4, %p618_p3 }
  0x1b   : > { %p622_p8 = por %p621_p7, %p620_p5 }
  0x1d   : > { %p623_p9 = pnand %p622_p8, %p616_p2 }
  0x1f   : > { %626 = shalt.err (!%p623_p9)
}
  0x20   : > { %s627_s13 = scalar_lea.vmem %s796_s27, 256  ;;  %s710_s14 = smov [#allocation2]  }
  0x21   : > { %p628_p13 = scmp.ne.s32.totalorder %s796_s27, %s627_s13  ;;  %s632_s16 = sshll.u32 %s710_s14, 4  ;;  %s633_s16 = int_to_ptr.vmem [resolvable:$false] %s632_s16 }
  0x22   : > { %s634_s20 = scalar_lea.vmem %s633_s16, 512  ;;  %p635_p10 = scmp.lt.s32.totalorder %s796_s27, %s633_s16 }
  0x23   : > { %p630_p1 = pnand %p628_p13, %p614_p0  ;;  %p636_p3 = scmp.lt.s32.totalorder %s634_s20, %s627_s13 }
  0x25   : > { %p631_p11 = pneg %p630_p1  ;;  %p637_p4 = por %p636_p3, %p635_p10 }
  0x27   : > { %p638_p5 = pnand %p637_p4, %p631_p11 }
  0x29   : > { %641 = shalt.err (!%p638_p5)
}
  0x2a   : > { %s711_s21 = smov 64   ;;  %s712_s22 = smov 4  }
  0x2b   : > { %529 = dma.hbm_to_vmem [thread:$0]  (!%p792_p12), %s788_s25, 256, %s796_s27, %s798_s29, %s711_s21, %s711_s21, %s712_s22  }
  0x2c   : > { %p509_p0 = scmp.ge.s32.totalorder %s708_s9, 1  ;;  %p106_p2 = scmp.lt.s32.totalorder %s708_s9, 5 }
  0x2e   : > { %p107_p7 = pnand %p509_p0, %p106_p2 }
  0x2f   : > { %s829_s23 = sand.u32 (!%p107_p7), 1, %s700_s7  }
  0x30   : > { %110 = sbr.rel (%p107_p7) target bundleno = 139 (0x8b), region = 24  ;;  %s510_s24 = sshll.u32 (!%p107_p7), %s829_s23, 4 }
  0x31   : > { %s113_s26 = scalar_lea.sflag (!%p107_p7), [#allocation3], %s829_s23  ;;  %s116_s30 = scalar_lea.vmem (!%p107_p7), [#allocation2], %s510_s24 }
  0x37   : > { %687 = dma.done.wait (%p769_p6), %s113_s26, 256  }
  0x38   : > { %689 = vsyncadd (%p769_p6), %s113_s26, 4294967040  ;;  %v839_v0 = vld [vmem:[%s116_s30] sm:$0xf]  ;;  %v841_v1 = vld [vmem:[%s116_s30 + $0x4] sm:$0xf]  ;;  %vm320_vm0 = vcmask 1041409  }
  0x39   : > { %v843_v2 = vld [vmem:[%s116_s30 + $0x8] sm:$0xf]  ;;  %v845_v3 = vld [vmem:[%s116_s30 + $0xc] sm:$0xf]  ;;  %v143_v4 = vrot.slane %v839_v0, 1  ;;  %v144_v5 = vrot.slane %v841_v1, 1 }
  0x3a   : > { %v145_v6 = vrot.slane %v843_v2, 1  ;;  %v155_v7 = vrot.slane %v839_v0, 2  ;;  %v146_v8 = vrot.slane %v845_v3, 1  ;;  %v156_v9 = vrot.slane %v841_v1, 2  ;;  %s933_s17 = scalar_lea.vmem [#allocation5], %s510_s24  ;;  %s521_s27 = sshll.u32 %s747_s10, 8 }
  0x3b   : > { %v157_v10 = vrot.slane %v843_v2, 2  ;;  %v158_v11 = vrot.slane %v845_v3, 2  ;;  %v151_v12 = vmax.f32 %v839_v0, %v143_v4  ;;  %v152_v13 = vmax.f32 %v841_v1, %v144_v5  ;;  %s430_s25 = sshll.u32 %s933_s17, 4  ;;  %s957_s10 = scalar_lea.hbm %s1003_s1, %s521_s27  ;;  %s951_s25 = int_to_ptr.vmem [resolvable:$true] %s430_s25 }
  0x3c   : > { %v153_v14 = vmax.f32 %v843_v2, %v145_v6  ;;  %v167_v15 = vrot.slane %v839_v0, 3  ;;  %v154_v16 = vmax.f32 %v845_v3, %v146_v8  ;;  %v168_v17 = vrot.slane %v841_v1, 3  ;;  %s417_s2 = scalar_lea.sflag [#allocation4], %s829_s23  ;;  %s642_s3 = scalar_lea.vmem %s951_s25, 256 }
  0x3d   : > { %v169_v18 = vrot.slane %v843_v2, 3  ;;  %v170_v19 = vrot.slane %v845_v3, 3  ;;  %v163_v20 = vmax.f32 %v151_v12, %v155_v7  ;;  %v164_v21 = vmax.f32 %v152_v13, %v156_v9  ;;  %p643_p6 = scmp.ne.s32.totalorder %s951_s25, %s642_s3  ;;  %p1010_p10 = scmp.ne.s32.totalorder %s1007_s18, 0 }
  0x3e   : > { %v165_v22 = vmax.f32 %v153_v14, %v157_v10  ;;  %v166_v23 = vmax.f32 %v154_v16, %v158_v11  ;;  %vm323_vm1 = vcmask 1042434   ;;  %vm326_vm2 = vcmask 1043459   ;;  %s713_s4 = smov [#allocation5]  }
  0x3f   : > { %v175_v24 = vmax.f32 %v163_v20, %v167_v15  ;;  %v176_v25 = vmax.f32 %v164_v21, %v168_v17  ;;  %vm329_vm3 = vcmask 27648   ;;  %vm360_vm4 = vcmask 28673   ;;  %p644_p11 = pnand %p643_p6, %p1010_p10  ;;  %s646_s5 = sshll.u32 %s713_s4, 4  ;;  %s647_s5 = int_to_ptr.vmem [resolvable:$false] %s646_s5 }
  0x40   : > { %v177_v26 = vmax.f32 %v165_v22, %v169_v18  ;;  %v178_v27 = vmax.f32 %v166_v23, %v170_v19  ;;  %vm356_vm5 = vcmask 1044484   ;;  %vm383_vm6 = vcmask 1045509   ;;  %s648_s11 = scalar_lea.vmem %s647_s5, 512  ;;  %p649_p8 = scmp.lt.s32.totalorder %s951_s25, %s647_s5 }
  0x41   : > { %v179_v28 = vsub.f32 %v839_v0, %v175_v24  ;;  %v180_v29 = vsub.f32 %v841_v1, %v176_v25  ;;  %v195_v31 = vrot.slane %v175_v24, 7  ;;  %v196_v33 = vrot.slane %v176_v25, 7  ;;  %p645_p12 = pneg %p644_p11  ;;  %p650_p9 = scmp.lt.s32.totalorder %s648_s11, %s642_s3 }
  0x42   : > { %v181_v30 = vsub.f32 %v843_v2, %v177_v26  ;;  %v182_v32 = vsub.f32 %v845_v3, %v178_v27  ;;  %v197_v34 = vrot.slane %v177_v26, 7  ;;  %v198_v35 = vrot.slane %v178_v27, 7 }
  0x43   : > { %v183_v36 = vmul.f32 1.442695, %v179_v28  ;;  %v185_v37 = vmul.f32 1.442695, %v180_v29  ;;  %v203_v39 = vsub.f32 %v839_v0, %v195_v31  ;;  %v204_v41 = vsub.f32 %v841_v1, %v196_v33  ;;  %p651_p13 = por %p650_p9, %p649_p8 }
  0x44   : > { %v187_v38 = vmul.f32 1.442695, %v181_v30  ;;  %v189_v40 = vmul.f32 1.442695, %v182_v32  ;;  %v205_v42 = vsub.f32 %v843_v2, %v197_v34  ;;  %v206_v43 = vsub.f32 %v845_v3, %v198_v35 }
  0x45   : > { %572 = vpow2.f32 %v183_v36  ;;  %v207_v44 = vmul.f32 1.442695, %v203_v39  ;;  %v215_v45 = vrot.slane %v175_v24, 6  ;;  %v216_v46 = vrot.slane %v176_v25, 6  ;;  %p652_p1 = pnand %p651_p13, %p645_p12 }
  0x46   : > { %574 = vpow2.f32 %v185_v37  ;;  %v209_v47 = vmul.f32 1.442695, %v204_v41  ;;  %v211_v48 = vmul.f32 1.442695, %v205_v42  ;;  %v213_v49 = vmul.f32 1.442695, %v206_v43 }
  0x47   : > { %576 = vpow2.f32 %v187_v38  ;;  %v217_v50 = vrot.slane %v177_v26, 6  ;;  %v218_v51 = vrot.slane %v178_v27, 6  ;;  %v223_v52 = vsub.f32 %v839_v0, %v215_v45 }
  0x48   : > { %578 = vpow2.f32 %v189_v40  ;;  %v224_v53 = vsub.f32 %v841_v1, %v216_v46  ;;  %v235_v54 = vrot.slane %v175_v24, 5  ;;  %v236_v55 = vrot.slane %v176_v25, 5 }
  0x49   : > { %580 = vpow2.f32 %v207_v44  ;;  %v225_v56 = vsub.f32 %v843_v2, %v217_v50  ;;  %v226_v57 = vsub.f32 %v845_v3, %v218_v51  ;;  %v227_v58 = vmul.f32 1.442695, %v223_v52 }
  0x4a   : > { %582 = vpow2.f32 %v209_v47  ;;  %v229_v59 = vmul.f32 1.442695, %v224_v53  ;;  %v237_v60 = vrot.slane %v177_v26, 5  ;;  %v238_v61 = vrot.slane %v178_v27, 5 }
  0x4b   : > { %584 = vpow2.f32 %v211_v48  ;;  %v231_v62 = vmul.f32 1.442695, %v225_v56  ;;  %v233_v63 = vmul.f32 1.442695, %v226_v57  ;;  %v243_v4 = vsub.f32 %v839_v0, %v235_v54 }
  0x4c   : > { %586 = vpow2.f32 %v213_v49  ;;  %v244_v5 = vsub.f32 %v841_v1, %v236_v55  ;;  %v245_v6 = vsub.f32 %v843_v2, %v237_v60  ;;  %v246_v7 = vsub.f32 %v845_v3, %v238_v61 }
  0x4d   : > { %588 = vpow2.f32 %v227_v58  ;;  %v247_v8 = vmul.f32 1.442695, %v243_v4  ;;  %vm387_vm7 = vcmask 29698   ;;  %vm410_vm8 = vcmask 1046534  }
  0x4e   : > { %590 = vpow2.f32 %v229_v59  ;;  %v249_v9 = vmul.f32 1.442695, %v244_v5  ;;  %v251_v11 = vmul.f32 1.442695, %v245_v6  ;;  %v253_v13 = vmul.f32 1.442695, %v246_v7 }
  0x4f   : > { %v573_v10 = vpop.eup %572  ;;  %592 = vpow2.f32 %v231_v62  ;;  %vm414_vm9 = vcmask 30723  }
  0x50   : > { %v575_v12 = vpop.eup %574  ;;  %594 = vpow2.f32 %v233_v63 }
  0x51   : > { %v879_v14 = vpop.eup %576  ;;  %596 = vpow2.f32 %v247_v8 }
  0x52   : > { %v881_v0 = vpop.eup %578  ;;  %598 = vpow2.f32 %v249_v9 }
  0x53   : > { %v883_v1 = vpop.eup %580  ;;  %600 = vpow2.f32 %v251_v11 }
  0x54   : > { %v885_v2 = vpop.eup %582  ;;  %602 = vpow2.f32 %v253_v13  ;;  %v259_v3 = vrot.slane %v883_v1, 1 }
  0x55   : > { %v888_v15 = vpop.eup %584  ;;  %v260_v16 = vrot.slane %v885_v2, 1 }
  0x56   : > { %v891_v17 = vpop.eup %586  ;;  %v261_v18 = vrot.slane %v888_v15, 1  ;;  %v267_v19 = vadd.f32 %v573_v10, %v259_v3 }
  0x57   : > { %v589_v20 = vpop.eup %588  ;;  %v262_v21 = vrot.slane %v891_v17, 1  ;;  %v268_v22 = vadd.f32 %v575_v12, %v260_v16 }
  0x58   : > { %v895_v23 = vpop.eup %590  ;;  %v269_v24 = vadd.f32 %v879_v14, %v261_v18  ;;  %v275_v25 = vrot.slane %v589_v20, 2 }
  0x59   : > { %v898_v26 = vpop.eup %592  ;;  %v270_v27 = vadd.f32 %v881_v0, %v262_v21  ;;  %v276_v28 = vrot.slane %v895_v23, 2 }
  0x5a   : > { %v902_v29 = vpop.eup %594  ;;  %v277_v30 = vrot.slane %v898_v26, 2  ;;  %v283_v31 = vadd.f32 %v275_v25, %v267_v19 }
  0x5b   : > { %v905_v32 = vpop.eup %596  ;;  %v278_v33 = vrot.slane %v902_v29, 2  ;;  %v284_v34 = vadd.f32 %v276_v28, %v268_v22 }
  0x5c   : > { %v908_v35 = vpop.eup %598  ;;  %v285_v36 = vadd.f32 %v277_v30, %v269_v24  ;;  %v291_v37 = vrot.slane %v905_v32, 3 }
  0x5d   : > { %v911_v38 = vpop.eup %600  ;;  %v286_v39 = vadd.f32 %v278_v33, %v270_v27  ;;  %v292_v40 = vrot.slane %v908_v35, 3 }
  0x5e   : > { %v914_v41 = vpop.eup %602  ;;  %v293_v42 = vrot.slane %v911_v38, 3  ;;  %v299_v43 = vadd.f32 %v291_v37, %v283_v31 }
  0x5f   : > { %v294_v44 = vrot.slane %v914_v41, 3  ;;  %v300_v45 = vadd.f32 %v292_v40, %v284_v34 }
  0x60   : > { %v301_v46 = vadd.f32 %v293_v42, %v285_v36  ;;  %604 = vrcp.f32 %v299_v43 }
  0x61   : > { %v302_v47 = vadd.f32 %v294_v44, %v286_v39  ;;  %606 = vrcp.f32 %v300_v45 }
  0x62   : > { %608 = vrcp.f32 %v301_v46 }
  0x63   : > { %610 = vrcp.f32 %v302_v47 }
  0x6a   : > { %v605_v48 = vpop.eup %604 }
  0x6b   : > { %v607_v49 = vpop.eup %606  ;;  %v311_v50 = vmul.f32 %v605_v48, %v573_v10  ;;  %v335_v51 = vrot.slane %v605_v48, 7  ;;  %v362_v52 = vrot.slane %v605_v48, 6  ;;  %v389_v53 = vrot.slane %v605_v48, 5 }
  0x6c   : > { %v609_v54 = vpop.eup %608  ;;  %v312_v55 = vmul.f32 %v607_v49, %v575_v12  ;;  %v336_v56 = vrot.slane %v607_v49, 7  ;;  %v363_v57 = vrot.slane %v607_v49, 6  ;;  %v390_v58 = vrot.slane %v607_v49, 5 }
  0x6d   : > { %v611_v59 = vpop.eup %610  ;;  %v313_v60 = vmul.f32 %v609_v54, %v879_v14  ;;  %v337_v61 = vrot.slane %v609_v54, 7  ;;  %v343_v62 = vmul.f32 %v883_v1, %v335_v51  ;;  %v364_v63 = vrot.slane %v609_v54, 6 }
  0x6e   : > { %v314_v4 = vmul.f32 %v611_v59, %v881_v0  ;;  %v319_v5 = vrot.slane %v312_v55, 7  ;;  %v338_v6 = vrot.slane %v611_v59, 7  ;;  %v344_v7 = vmul.f32 %v885_v2, %v336_v56 }
  0x6f   : > { %v322_v8 = vrot.slane %v313_v60, 6  ;;  %v345_v9 = vmul.f32 %v888_v15, %v337_v61  ;;  %v365_v10 = vrot.slane %v611_v59, 6  ;;  %v370_v11 = vmul.f32 %v589_v20, %v362_v52 }
  0x70   : > { %v321_v12 = vsel %vm320_vm0, %v319_v5, %v311_v50  ;;  %v325_v13 = vrot.slane %v314_v4, 5  ;;  %v346_v14 = vmul.f32 %v891_v17, %v338_v6  ;;  %v351_v3 = vrot.slane %v344_v7, 7 }
  0x71   : > { %v324_v1 = vsel %vm323_vm1, %v322_v8, %v321_v12  ;;  %v353_v16 = vrot.slane %v345_v9, 6  ;;  %v371_v0 = vmul.f32 %v895_v23, %v363_v57  ;;  %v372_v18 = vmul.f32 %v898_v26, %v364_v63 }
  0x72   : > { %v327_v2 = vsel %vm326_vm2, %v325_v13, %v324_v1  ;;  %v352_v19 = vsel %vm323_vm1, %v351_v3, %v343_v62  ;;  %v355_v15 = vrot.slane %v346_v14, 5  ;;  %v373_v20 = vmul.f32 %v902_v29, %v365_v10 }
  0x73   : > { %330 = vst.msk [vmem:[%s933_s17] sm:$0xf] %vm329_vm3, %v327_v2  ;;  %v354_v17 = vsel %vm326_vm2, %v353_v16, %v352_v19  ;;  %v378_v21 = vrot.slane %v371_v0, 7  ;;  %v380_v22 = vrot.slane %v372_v18, 6  ;;  %v391_v23 = vrot.slane %v609_v54, 5 }
  0x74   : > { %v357_v24 = vsel %vm356_vm5, %v355_v15, %v354_v17  ;;  %v382_v25 = vrot.slane %v373_v20, 5  ;;  %v392_v26 = vrot.slane %v611_v59, 5  ;;  %v397_v28 = vmul.f32 %v905_v32, %v389_v53 }
  0x75   : > { %512 = vst.msk [vmem:[%s933_s17 + $0x3] sm:$0x1e] %vm360_vm4, %v357_v24  ;;  %v379_v27 = vsel %vm326_vm2, %v378_v21, %v370_v11  ;;  %v398_v29 = vmul.f32 %v908_v35, %v390_v58  ;;  %v399_v30 = vmul.f32 %v911_v38, %v391_v23 }
  0x76   : > { %v381_v31 = vsel %vm356_vm5, %v380_v22, %v379_v27  ;;  %v400_v33 = vmul.f32 %v914_v41, %v392_v26 }
  0x77   : > { %v384_v34 = vsel %vm383_vm6, %v382_v25, %v381_v31  ;;  %v405_v36 = vrot.slane %v398_v29, 7  ;;  %v407_v37 = vrot.slane %v399_v30, 6 }
  0x78   : > { %513 = vst.msk [vmem:[%s933_s17 + $0x6] sm:$0x3c] %vm387_vm7, %v384_v34  ;;  %v409_v39 = vrot.slane %v400_v33, 5 }
  0x79   : > { %v406_v32 = vsel %vm356_vm5, %v405_v36, %v397_v28 }
  0x7a   : > { %v408_v35 = vsel %vm383_vm6, %v407_v37, %v406_v32 }
  0x7b   : > { %v411_v38 = vsel %vm410_vm8, %v409_v39, %v408_v35 }
  0x7c   : > { %514 = vst.msk [vmem:[%s933_s17 + $0x9] sm:$0x78] %vm414_vm9, %v411_v38 }
  0x7d   : > { %655 = shalt.err (!%p652_p1)
}
  0x7e   : > { %s656_s13 = scalar_lea.hbm %s957_s10, 256  ;;  %s660_s20 = scalar_lea.hbm %s1003_s1, 1024 }
  0x7f   : > { %p657_p3 = scmp.ne.s32.totalorder %s957_s10, %s656_s13  ;;  %p661_p0 = scmp.lt.u32.totalorder %s957_s10, %s1003_s1 }
  0x80   : > { %p662_p2 = scmp.lt.u32.totalorder %s660_s20, %s656_s13  ;;  %p664_p6 = scmp.lt.u32.totalorder %s656_s13, %s957_s10 }
  0x81   : > { %p658_p4 = pnand %p657_p3, %p1010_p10 }
  0x82   : > { %p663_p7 = por %p662_p2, %p661_p0 }
  0x83   : > { %p659_p5 = pneg %p658_p4 }
  0x84   : > { %p665_p11 = por %p664_p6, %p663_p7 }
  0x86   : > { %p666_p12 = pnand %p665_p11, %p659_p5 }
  0x88   : > { %669 = shalt.err (!%p666_p12)
}
  0x89   : > { %s714_s24 = smov 64   ;;  %s715_s26 = smov 4  }
  0x8a   : > { %524 = dma.vmem_to_hbm [thread:$0]  (%p1010_p10), %s951_s25, 256, %s957_s10, %s417_s2, %s714_s24, %s714_s24, %s715_s26  }
  0x8b PF: > { %p535_p8 = scmp.ge.s32.totalorder %s708_s9, 2  ;;  %s445_s30 = sand.u32 1, %s696_s6  }
  0x8c   : > { %p1011_p9 = scmp.ne.s32.totalorder %s1008_s19, 0  ;;  %s446_s17 = scalar_lea.sflag [#allocation4], %s445_s30 }
  0x8e   : > { %p531_p13 = pnand %p535_p8, %p1011_p9 }
  0x90   : > { %691 = dma.done.wait (!%p531_p13), %s446_s17, 256  }
  0x91   : > { %693 = vsyncadd (!%p531_p13), %s446_s17, 4294967040  ;;  %p14_p1 = scmp.ge.s32.totalorder %s751_s12, 6   ;;  %s1012_s6 = smov %s700_s7 }
  0x92   : > { %s1013_s7 = smov %s704_s8  ;;  %s1014_s8 = smov %s763_s15 }
  0x93   : > { %s1015_s9 = smov %s751_s12  ;;  %16 = sbr.rel (!%p14_p1) target bundleno = 5 (0x5), region = 72 }
  0x9a   :  { %451 = vsyncpa [#allocation3], 1 }
  0x9b   :  { %453 = vsyncpa [#allocation3 + $0x1], 1 }
  0x9c   :  { %454 = vsyncpa [#allocation4], 1 }
  0x9d   :  { %456 = vsyncpa [#allocation4 + $0x1], 1 }

</bundles_post_ra>
